<compile_context>
chip_gen: v5e
topology: v5e:2x2
jax: 0.10.0
libtpu: 0.0.40
codegen_flags: <defaults>
</compile_context>

<pallas_src>
import jax
import jax.numpy as jnp
from jax.experimental import pallas as pl
from jax.experimental.pallas import tpu as pltpu


_SELECT_MAX_PARTITIONS = 32  # <= this: VPU select gather; above: one-hot MXU


def _gather_rows_kernel(pidx_ref, wg_ref, out_ref):
    """Gather weight_groups rows for one (batch, seq-tile) output block.

    pidx_ref: [1, TILE_S, 1]    int32  per-row partition id (sublane-oriented)
    wg_ref:   [P, NHID]         f32    grid-invariant (stays VMEM-resident)
    out_ref:  [1, TILE_S, NHID] f32
    """
    parts, nhid = wg_ref.shape
    tile_s = out_ref.shape[1]
    pidx = pidx_ref[0, :, :]                                 # [TILE_S, 1]

    if parts <= _SELECT_MAX_PARTITIONS:
        # Exact gather as `parts` VPU select passes: out[r, :] = wg[pidx[r], :].
        acc = jnp.zeros((tile_s, nhid), dtype=out_ref.dtype)
        for p in range(parts):
            row = wg_ref[pl.ds(p, 1), :]                     # [1, NHID]
            acc = jnp.where(pidx == p, row, acc)
        out_ref[0, :, :] = acc
    else:
        # One-hot matmul on the MXU for large partition counts; HIGHEST
        # precision keeps the {0,1} x f32 products exact.
        part_iota = jax.lax.broadcasted_iota(jnp.int32, (tile_s, parts), 1)
        onehot = (part_iota == pidx).astype(wg_ref.dtype)    # [TILE_S, P]
        out_ref[0, :, :] = jnp.dot(
            onehot, wg_ref[...],
            preferred_element_type=jnp.float32,
            precision=jax.lax.Precision.HIGHEST,
        ).astype(out_ref.dtype)


def _pick_tile_s(S, nhid):
    """~2 MiB of f32 output per grid step, capped so double-buffered output
    (+ the lane-padded index block, tile*512 B) stays well inside the 16 MiB
    scoped-VMEM default (v5e) and v7x's 64 MiB total."""
    target_rows = (2 * 1024 * 1024) // max(4 * nhid, 1)
    tile_s = max(8, min(S, target_rows, 4096))
    if tile_s >= S:
        return S
    tile_s = (tile_s // 8) * 8
    # Prefer a tile that divides S (no ragged, store-masked edge block);
    # otherwise keep the target tile and let Pallas mask the edge.
    for cand in range(tile_s, max(tile_s // 2, 8) - 1, -8):
        if S % cand == 0:
            return cand
    return tile_s


def differentiable_softmax_forward(input_idx, partidx_table, weight_groups,
                                   *, tile_s=None, use_pallas=None):
    """input_idx: [B, S] int, partidx_table: [ntokens] int,
    weight_groups: [partitions, nhid] f32.
    Returns (partidx [B, S] int32, gathered [B, S, nhid] f32)."""
    B, S = input_idx.shape
    partitions, nhid = weight_groups.shape

    # partidx = partidx_table[input_idx]: tiny O(N) int gather, left to XLA.
    partidx = jnp.take(partidx_table.astype(jnp.int32),
                       input_idx.astype(jnp.int32), axis=0)          # [B, S]

    # NOTE: keep the weight table f32 at init so this cast is a no-op per call.
    wg = weight_groups
    if wg.dtype != jnp.float32:
        wg = wg.astype(jnp.float32)

    if use_pallas is None:
        # Below one lane-row of payload per token, grid/launch overhead
        # dominates and the plain XLA gather wins (per perf review).
        use_pallas = nhid >= 128
    if not use_pallas:
        return partidx, jnp.take(wg, partidx, axis=0)

    if tile_s is None:
        tile_s = _pick_tile_s(S, nhid)
    tile_s = max(1, min(tile_s, S))
    grid = (B, pl.cdiv(S, tile_s))

    # Sublane-oriented per-row partition ids: the trailing unit dim keeps the
    # block's last two dims (tile_s, 1) legal and lines the ids up with the
    # output rows without any in-kernel relayout.
    pidx3 = partidx.reshape(B, S, 1)

    gathered = pl.pallas_call(
        _gather_rows_kernel,
        out_shape=jax.ShapeDtypeStruct((B, S, nhid), jnp.float32),
        grid=grid,
        in_specs=[
            pl.BlockSpec((1, tile_s, 1), lambda b, j: (b, j, 0)),
            # Grid-invariant block: Pallas only DMAs it when the block index
            # changes, so the weight table effectively stays VMEM-resident.
            pl.BlockSpec((partitions, nhid), lambda b, j: (0, 0)),
        ],
        out_specs=pl.BlockSpec((1, tile_s, nhid), lambda b, j: (b, j, 0)),
        compiler_params=pltpu.CompilerParams(
            dimension_semantics=("parallel", "parallel"),
        ),
        cost_estimate=pl.CostEstimate(
            flops=2 * B * S * partitions * nhid,
            transcendentals=0,
            bytes_accessed=(B * S * 4                 # partition ids in
                            + partitions * nhid * 4   # weight groups in
                            + B * S * nhid * 4),      # gathered rows out
        ),
    )(pidx3, wg)
    return partidx, gathered


def _check(input_idx, partidx_table, weight_groups, **kw):
    pidx, gathered = differentiable_softmax_forward(
        input_idx, partidx_table, weight_groups, **kw)
    jax.block_until_ready((pidx, gathered))
    ref_pidx = partidx_table[input_idx]
    ref_gathered = weight_groups[ref_pidx]
    assert pidx.shape == ref_pidx.shape
    assert gathered.shape == ref_gathered.shape
    assert jnp.array_equal(pidx, ref_pidx)
    # Exact: the select-based gather copies the original weight bits.
    assert jnp.array_equal(gathered, ref_gathered)


if __name__ == "__main__":
    key = jax.random.PRNGKey(0)
    k_wg, k_idx, k_wg2, k_idx2 = jax.random.split(key, 4)

    # Small config consistent with the module: vocab `ntokens`, hidden `nhid`,
    # `partitions` weight groups.
    ntokens, nhid, partitions = 32, 32, 10
    B, S = 2, 8

    # Deterministic token -> partition assignment (stand-in for the unigram
    # based partitioning of the original module).
    partidx_table = jnp.minimum(
        jnp.arange(ntokens, dtype=jnp.int32) * partitions // ntokens,
        partitions - 1).astype(jnp.int32)
    weight_groups = jax.random.normal(k_wg, (partitions, nhid), dtype=jnp.float32)
    input_idx = jax.random.randint(k_idx, (B, S), 0, ntokens, dtype=jnp.int32)

    # 1) Module-spec shapes; force the Pallas path (the auto heuristic would
    #    route nhid=32 to the XLA fallback).
    _check(input_idx, partidx_table, weight_groups, use_pallas=True)

    # 2) Same shapes through the auto path (small-nhid XLA fallback).
    _check(input_idx, partidx_table, weight_groups)

    # 3) Lane-dense hidden size + multi-step grid (exercises pipelining and
    #    the two-TensorCore "parallel" sharding on v7x).
    ntokens2, nhid2 = 64, 256
    partidx_table2 = jnp.minimum(
        jnp.arange(ntokens2, dtype=jnp.int32) * partitions // ntokens2,
        partitions - 1).astype(jnp.int32)
    weight_groups2 = jax.random.normal(k_wg2, (partitions, nhid2),
                                       dtype=jnp.float32)
    input_idx2 = jax.random.randint(k_idx2, (4, 512), 0, ntokens2,
                                    dtype=jnp.int32)
    _check(input_idx2, partidx_table2, weight_groups2)

    print("KERNEL_OK")
</pallas_src>

<mosaic_0001>
module attributes {stable_mosaic.version = 11 : i64} {
  func.func @_gather_rows_kernel(%arg0: i32, %arg1: i32, %arg2: memref<1x8x1xi32, #tpu.memory_space<vmem>>, %arg3: memref<10x32xf32, #tpu.memory_space<vmem>>, %arg4: memref<1x8x32xf32, #tpu.memory_space<vmem>>) attributes {dimension_semantics = [#tpu.dimension_semantics<parallel>, #tpu.dimension_semantics<parallel>], iteration_bounds = array<i64: 2, 1>, scalar_prefetch = 0 : i64, scratch_operands = 0 : i64, tpu.core_type = #tpu.core_type<tc>, window_params = [{transform_indices = @transform_0, window_bounds = array<i64: 1, 8, 1>}, {pipeline_mode = #tpu.pipeline_mode<synchronous>, transform_indices = @transform_1, window_bounds = array<i64: 10, 32>}, {transform_indices = @transform_2, window_bounds = array<i64: 1, 8, 32>}]} {
    %c0 = arith.constant 0 : index
    %c0_0 = arith.constant 0 : index
    %c0_1 = arith.constant 0 : index
    %0 = vector.load %arg2[%c0, %c0_0, %c0_1] : memref<1x8x1xi32, #tpu.memory_space<vmem>>, vector<1x8x1xi32>
    %1 = vector.shape_cast %0 : vector<1x8x1xi32> to vector<8x1xi32>
    %cst = arith.constant 0.000000e+00 : f32
    %2 = vector.broadcast %cst : f32 to vector<8x32xf32>
    %c0_2 = arith.constant 0 : index
    %c0_3 = arith.constant 0 : index
    %3 = vector.load %arg3[%c0_2, %c0_3] : memref<10x32xf32, #tpu.memory_space<vmem>>, vector<1x32xf32>
    %c0_i32 = arith.constant 0 : i32
    %4 = vector.broadcast %c0_i32 : i32 to vector<8x1xi32>
    %5 = arith.cmpi eq, %1, %4 : vector<8x1xi32>
    %6 = vector.shape_cast %5 : vector<8x1xi1> to vector<8x1xi1>
    %7 = vector.broadcast %6 : vector<8x1xi1> to vector<8x32xi1>
    %8 = vector.shape_cast %3 : vector<1x32xf32> to vector<1x32xf32>
    %9 = vector.broadcast %8 : vector<1x32xf32> to vector<8x32xf32>
    %10 = arith.select %7, %9, %2 : vector<8x32xi1>, vector<8x32xf32>
    %c1 = arith.constant 1 : index
    %c0_4 = arith.constant 0 : index
    %11 = vector.load %arg3[%c1, %c0_4] : memref<10x32xf32, #tpu.memory_space<vmem>>, vector<1x32xf32>
    %c1_i32 = arith.constant 1 : i32
    %12 = vector.broadcast %c1_i32 : i32 to vector<8x1xi32>
    %13 = arith.cmpi eq, %1, %12 : vector<8x1xi32>
    %14 = vector.shape_cast %13 : vector<8x1xi1> to vector<8x1xi1>
    %15 = vector.broadcast %14 : vector<8x1xi1> to vector<8x32xi1>
    %16 = vector.shape_cast %11 : vector<1x32xf32> to vector<1x32xf32>
    %17 = vector.broadcast %16 : vector<1x32xf32> to vector<8x32xf32>
    %18 = arith.select %15, %17, %10 : vector<8x32xi1>, vector<8x32xf32>
    %c2 = arith.constant 2 : index
    %c0_5 = arith.constant 0 : index
    %19 = vector.load %arg3[%c2, %c0_5] : memref<10x32xf32, #tpu.memory_space<vmem>>, vector<1x32xf32>
    %c2_i32 = arith.constant 2 : i32
    %20 = vector.broadcast %c2_i32 : i32 to vector<8x1xi32>
    %21 = arith.cmpi eq, %1, %20 : vector<8x1xi32>
    %22 = vector.shape_cast %21 : vector<8x1xi1> to vector<8x1xi1>
    %23 = vector.broadcast %22 : vector<8x1xi1> to vector<8x32xi1>
    %24 = vector.shape_cast %19 : vector<1x32xf32> to vector<1x32xf32>
    %25 = vector.broadcast %24 : vector<1x32xf32> to vector<8x32xf32>
    %26 = arith.select %23, %25, %18 : vector<8x32xi1>, vector<8x32xf32>
    %c3 = arith.constant 3 : index
    %c0_6 = arith.constant 0 : index
    %27 = vector.load %arg3[%c3, %c0_6] : memref<10x32xf32, #tpu.memory_space<vmem>>, vector<1x32xf32>
    %c3_i32 = arith.constant 3 : i32
    %28 = vector.broadcast %c3_i32 : i32 to vector<8x1xi32>
    %29 = arith.cmpi eq, %1, %28 : vector<8x1xi32>
    %30 = vector.shape_cast %29 : vector<8x1xi1> to vector<8x1xi1>
    %31 = vector.broadcast %30 : vector<8x1xi1> to vector<8x32xi1>
    %32 = vector.shape_cast %27 : vector<1x32xf32> to vector<1x32xf32>
    %33 = vector.broadcast %32 : vector<1x32xf32> to vector<8x32xf32>
    %34 = arith.select %31, %33, %26 : vector<8x32xi1>, vector<8x32xf32>
    %c4 = arith.constant 4 : index
    %c0_7 = arith.constant 0 : index
    %35 = vector.load %arg3[%c4, %c0_7] : memref<10x32xf32, #tpu.memory_space<vmem>>, vector<1x32xf32>
    %c4_i32 = arith.constant 4 : i32
    %36 = vector.broadcast %c4_i32 : i32 to vector<8x1xi32>
    %37 = arith.cmpi eq, %1, %36 : vector<8x1xi32>
    %38 = vector.shape_cast %37 : vector<8x1xi1> to vector<8x1xi1>
    %39 = vector.broadcast %38 : vector<8x1xi1> to vector<8x32xi1>
    %40 = vector.shape_cast %35 : vector<1x32xf32> to vector<1x32xf32>
    %41 = vector.broadcast %40 : vector<1x32xf32> to vector<8x32xf32>
    %42 = arith.select %39, %41, %34 : vector<8x32xi1>, vector<8x32xf32>
    %c5 = arith.constant 5 : index
    %c0_8 = arith.constant 0 : index
    %43 = vector.load %arg3[%c5, %c0_8] : memref<10x32xf32, #tpu.memory_space<vmem>>, vector<1x32xf32>
    %c5_i32 = arith.constant 5 : i32
    %44 = vector.broadcast %c5_i32 : i32 to vector<8x1xi32>
    %45 = arith.cmpi eq, %1, %44 : vector<8x1xi32>
    %46 = vector.shape_cast %45 : vector<8x1xi1> to vector<8x1xi1>
    %47 = vector.broadcast %46 : vector<8x1xi1> to vector<8x32xi1>
    %48 = vector.shape_cast %43 : vector<1x32xf32> to vector<1x32xf32>
    %49 = vector.broadcast %48 : vector<1x32xf32> to vector<8x32xf32>
    %50 = arith.select %47, %49, %42 : vector<8x32xi1>, vector<8x32xf32>
    %c6 = arith.constant 6 : index
    %c0_9 = arith.constant 0 : index
    %51 = vector.load %arg3[%c6, %c0_9] : memref<10x32xf32, #tpu.memory_space<vmem>>, vector<1x32xf32>
    %c6_i32 = arith.constant 6 : i32
    %52 = vector.broadcast %c6_i32 : i32 to vector<8x1xi32>
    %53 = arith.cmpi eq, %1, %52 : vector<8x1xi32>
    %54 = vector.shape_cast %53 : vector<8x1xi1> to vector<8x1xi1>
    %55 = vector.broadcast %54 : vector<8x1xi1> to vector<8x32xi1>
    %56 = vector.shape_cast %51 : vector<1x32xf32> to vector<1x32xf32>
    %57 = vector.broadcast %56 : vector<1x32xf32> to vector<8x32xf32>
    %58 = arith.select %55, %57, %50 : vector<8x32xi1>, vector<8x32xf32>
    %c7 = arith.constant 7 : index
    %c0_10 = arith.constant 0 : index
    %59 = vector.load %arg3[%c7, %c0_10] : memref<10x32xf32, #tpu.memory_space<vmem>>, vector<1x32xf32>
    %c7_i32 = arith.constant 7 : i32
    %60 = vector.broadcast %c7_i32 : i32 to vector<8x1xi32>
    %61 = arith.cmpi eq, %1, %60 : vector<8x1xi32>
    %62 = vector.shape_cast %61 : vector<8x1xi1> to vector<8x1xi1>
    %63 = vector.broadcast %62 : vector<8x1xi1> to vector<8x32xi1>
    %64 = vector.shape_cast %59 : vector<1x32xf32> to vector<1x32xf32>
    %65 = vector.broadcast %64 : vector<1x32xf32> to vector<8x32xf32>
    %66 = arith.select %63, %65, %58 : vector<8x32xi1>, vector<8x32xf32>
    %c8 = arith.constant 8 : index
    %c0_11 = arith.constant 0 : index
    %67 = vector.load %arg3[%c8, %c0_11] : memref<10x32xf32, #tpu.memory_space<vmem>>, vector<1x32xf32>
    %c8_i32 = arith.constant 8 : i32
    %68 = vector.broadcast %c8_i32 : i32 to vector<8x1xi32>
    %69 = arith.cmpi eq, %1, %68 : vector<8x1xi32>
    %70 = vector.shape_cast %69 : vector<8x1xi1> to vector<8x1xi1>
    %71 = vector.broadcast %70 : vector<8x1xi1> to vector<8x32xi1>
    %72 = vector.shape_cast %67 : vector<1x32xf32> to vector<1x32xf32>
    %73 = vector.broadcast %72 : vector<1x32xf32> to vector<8x32xf32>
    %74 = arith.select %71, %73, %66 : vector<8x32xi1>, vector<8x32xf32>
    %c9 = arith.constant 9 : index
    %c0_12 = arith.constant 0 : index
    %75 = vector.load %arg3[%c9, %c0_12] : memref<10x32xf32, #tpu.memory_space<vmem>>, vector<1x32xf32>
    %c9_i32 = arith.constant 9 : i32
    %76 = vector.broadcast %c9_i32 : i32 to vector<8x1xi32>
    %77 = arith.cmpi eq, %1, %76 : vector<8x1xi32>
    %78 = vector.shape_cast %77 : vector<8x1xi1> to vector<8x1xi1>
    %79 = vector.broadcast %78 : vector<8x1xi1> to vector<8x32xi1>
    %80 = vector.shape_cast %75 : vector<1x32xf32> to vector<1x32xf32>
    %81 = vector.broadcast %80 : vector<1x32xf32> to vector<8x32xf32>
    %82 = arith.select %79, %81, %74 : vector<8x32xi1>, vector<8x32xf32>
    %c0_13 = arith.constant 0 : index
    %c0_14 = arith.constant 0 : index
    %c0_15 = arith.constant 0 : index
    %83 = vector.load %arg4[%c0_13, %c0_14, %c0_15] : memref<1x8x32xf32, #tpu.memory_space<vmem>>, vector<1x8x32xf32>
    %84 = vector.shape_cast %83 : vector<1x8x32xf32> to vector<8x32xf32>
    %85 = vector.shape_cast %82 : vector<8x32xf32> to vector<1x8x32xf32>
    tpu.vector_store %arg4[%c0_13, %c0_14, %c0_15], %85 {strides = array<i32>} : memref<1x8x32xf32, #tpu.memory_space<vmem>>, vector<1x8x32xf32>,
    return
  }
  func.func @transform_0(%arg0: i32, %arg1: i32) -> (i32, i32, i32) {
    %c0_i32 = arith.constant 0 : i32
    %c0_i32_0 = arith.constant 0 : i32
    return %arg0, %arg1, %c0_i32 : i32, i32, i32
  }
  func.func @transform_1(%arg0: i32, %arg1: i32) -> (i32, i32) {
    %c0_i32 = arith.constant 0 : i32
    %c0_i32_0 = arith.constant 0 : i32
    %c0_i32_1 = arith.constant 0 : i32
    return %c0_i32, %c0_i32_0 : i32, i32
  }
  func.func @transform_2(%arg0: i32, %arg1: i32) -> (i32, i32, i32) {
    %c0_i32 = arith.constant 0 : i32
    %c0_i32_0 = arith.constant 0 : i32
    return %arg0, %arg1, %c0_i32 : i32, i32, i32
  }
}

</mosaic_0001>

<bundles_post_ra>
// kernel: tpu_custom_call.1
= control target key start
LH: loop header
LB: loop body
LE: loop exit
PB: predicated region body
PF: predicated region fallthrough
CT: control target
= control target key end

     0   :  { %7 = vsyncpa [#allocation3], 0  ;;  %s652_s0 = inlined_call_operand.vmem [shape: s32[2,8,1], index: 0, kind: input, shape index: {}]   ;;  %s653_s1 = inlined_call_operand.vmem [shape: f32[10,32], index: 1, kind: input, shape index: {}]   ;;  %s654_s2 = inlined_call_operand.hbm [shape: f32[2,8,32], index: 2, kind: output, shape index: {}]  }
   0x1   :  { %9 = vsyncpa [#allocation3 + $0x1], 0  ;;  %s521_s9 = smov 0   ;;  %s523_s10 = smov 0  }
   0x2   :  { %s525_s11 = smov 0   ;;  %s527_s12 = smov 0  }
   0x3   :  { %s529_s13 = smov 0   ;;  %s531_s14 = smov 0  }
   0x4 LB: > { %s345_s15 = sadd.s32 4294967295, %s503_s14   ;;  %s346_s16 = sadd.s32 4294967294, %s503_s14   ;;  %s503_s14 = sphi %s531_s14, %s15_s14   ;;  %s499_s13 = sphi %s529_s13, %s661_s13   ;;  %s495_s12 = sphi %s527_s12, %s660_s12   ;;  %s491_s11 = sphi %s525_s11, %s659_s11   ;;  %s487_s10 = sphi %s523_s10, %s658_s10   ;;  %s483_s9 = sphi %s521_s9, %s657_s9  }
   0x5   : > { %s27_s17 = sadd.s32 1, %s499_s13  ;;  %s85_s18 = sadd.s32 1, %s491_s11 }
   0x6   : > { %p29_p0 = scmp.ge.s32.totalorder %s27_s17, 2  ;;  %p95_p1 = scmp.ne.s32.totalorder %s491_s11, %s487_s10 }
   0x7   : > { %p96_p2 = scmp.eq.s32.totalorder %s345_s15, 1  ;;  %p101_p3 = scmp.ne.s32.totalorder %s487_s10, %s483_s9 }
   0x8   : > { %s663_s17 = smov (%p29_p0, %s27_s17), 0  ;;  %p102_p5 = scmp.eq.s32.totalorder %s346_s16, 1 }
   0x9   : > { %p561_p4 = por %p96_p2, %p95_p1  ;;  %s80_s20 = ssub.s32 %s499_s13, %s663_s17 }
   0xa   : > { %p349_p6 = scmp.ge.s32.totalorder %s503_s14, 1  ;;  %p83_p7 = scmp.eq.s32.totalorder %s80_s20, 0 }
   0xb   : > { %p568_p8 = por %p102_p5, %p101_p3  ;;  %p133_p9 = scmp.lt.s32.totalorder %s503_s14, 3 }
   0xc   : > { %s574_s22 = scalar_select %p83_p7, %s491_s11, %s85_s18  }
   0xd   : > { %p134_p10 = pnand %p349_p6, %p133_p9 }
   0xe   : > { %p157_p11 = scmp.lt.s32.totalorder (!%p134_p10), %s495_s12, 1  ;;  %s154_s16 = sand.u32 (!%p134_p10), 1, %s487_s10  }
   0xf   : > { %137 = sbr.rel (%p134_p10) target bundleno = 171 (0xab), region = 28  ;;  %s350_s25 = sshll.u32 (!%p134_p10), %s154_s16, 3 }
  0x10   : > { %s353_s26 = sshll.u32 (!%p134_p10), %s495_s12, 3  ;;  %s156_s7 = scalar_lea.vmem (!%p134_p10), [#allocation2], %s350_s25 }
  0x11   : > { %s269_s3 = scalar_lea.hbm (!%p134_p10), %s654_s2, %s353_s26  ;;  %s271_s8 = sshll.u32 (!%p134_p10), %s156_s7, 4  ;;  %s272_s8 = int_to_ptr.vmem [resolvable:$true] %s271_s8 }
  0x12   : > { %s273_s15 = sshll.u32 (!%p134_p10), %s269_s3, 4  ;;  %s258_s18 = scalar_lea.sflag (!%p134_p10), [#allocation3], %s154_s16  ;;  %s274_s15 = int_to_ptr.hbm [resolvable:$true] %s273_s15 }
  0x13   : > { %s439_s20 = sshra.s32 (!%p134_p10), %s274_s15, 4  ;;  %s445_s26 = scalar_lea.hbm (!%p134_p10), %s654_s2, 16  ;;  %s440_s20 = int_to_ptr.hbm [resolvable:$true] %s439_s20 }
  0x14   : > { %v505_v0 = vmov 0   ;;  %s158_s23 = scalar_select %p157_p11, %s495_s12, 1  ;;  %v415_v15 = vld [vmem:[%s653_s1] ss:$0 sm:$0xff]  ;;  %v416_v16 = vld [vmem:[%s653_s1 + $0x1] ss:$0 sm:$0xff] }
  0x15   : > { %413 = vset.pattern.permute.xlu1 %v505_v0  ;;  %412 = vset.pattern.permute.xlu0 %v505_v0  ;;  %v417_v17 = vld [vmem:[%s653_s1 + $0x2] ss:$0 sm:$0xff]  ;;  %v418_v19 = vld [vmem:[%s653_s1 + $0x3] ss:$0 sm:$0xff]  ;;  %v419_v25 = vld [vmem:[%s653_s1 + $0x4] ss:$0 sm:$0xff]  ;;  %p446_p1 = scmp.lt.s32.totalorder %s440_s20, %s654_s2 }
  0x16   : > { %414 = vset.pattern.permute.xlu2 %v505_v0  ;;  %s351_s24 = sshll.u32 %s158_s23, 3  ;;  %v420_v27 = vld [vmem:[%s653_s1 + $0x5] ss:$0 sm:$0xff]  ;;  %v421_v29 = vld [vmem:[%s653_s1 + $0x6] ss:$0 sm:$0xff]  ;;  %s441_s23 = scalar_lea.hbm %s440_s20, 8 }
  0x17   : > { %s163_s27 = scalar_lea.vmem %s652_s0, %s351_s24  ;;  %v422_v33 = vld [vmem:[%s653_s1 + $0x7] ss:$0 sm:$0xff]  ;;  %v423_v36 = vld [vmem:[%s653_s1 + $0x8] ss:$0 sm:$0xff]  ;;  %v424_v38 = vld [vmem:[%s653_s1 + $0x9] ss:$0 sm:$0xff]  ;;  %p442_p12 = scmp.ne.s32.totalorder %s440_s20, %s441_s23 }
  0x18   : > { %v164_v1 = vld [vmem:[%s163_s27] sm:$0xff]  ;;  %p447_p2 = scmp.lt.s32.totalorder %s445_s26, %s441_s23 }
  0x19   : > { %vm184_vm0 = vcmp.eq.s32.totalorder %v164_v1, 2  ;;  %vm166_vm1 = vcmp.eq.s32.totalorder %v164_v1, 0  ;;  %vm202_vm2 = vcmp.eq.s32.totalorder %v164_v1, 4  ;;  %vm193_vm3 = vcmp.eq.s32.totalorder %v164_v1, 3  ;;  %p443_p13 = pnand %p442_p12, %p561_p4 }
  0x1a   : > { %v185_v2 = vsel %vm184_vm0, 1, %v505_v0  ;;  %v167_v3 = vsel %vm166_vm1, 1, %v505_v0  ;;  %v203_v4 = vsel %vm202_vm2, 1, %v505_v0  ;;  %vm175_vm4 = vcmp.eq.s32.totalorder %v164_v1, 1  ;;  %p448_p3 = por %p447_p2, %p446_p1 }
  0x1b   : > { %187 = vperm.xlu1 %413, %v185_v2   ;;  %169 = vperm.xlu0 %412, %v167_v3   ;;  %vm211_vm5 = vcmp.eq.s32.totalorder %v164_v1, 5  ;;  %v194_v5 = vsel %vm193_vm3, 1, %v505_v0  ;;  %v176_v6 = vsel %vm175_vm4, 1, %v505_v0  ;;  %vm229_vm6 = vcmp.eq.s32.totalorder %v164_v1, 7  ;;  %p444_p0 = pneg %p443_p13 }
  0x1c   : > { %205 = vperm.xlu2 %414, %v203_v4   ;;  %v212_v7 = vsel %vm211_vm5, 1, %v505_v0  ;;  %vm220_vm7 = vcmp.eq.s32.totalorder %v164_v1, 6  ;;  %vm238_vm8 = vcmp.eq.s32.totalorder %v164_v1, 8  ;;  %v230_v8 = vsel %vm229_vm6, 1, %v505_v0 }
  0x1d   : > { %v221_v9 = vsel %vm220_vm7, 1, %v505_v0  ;;  %v239_v10 = vsel %vm238_vm8, 1, %v505_v0  ;;  %vm247_vm9 = vcmp.eq.s32.totalorder %v164_v1, 9  ;;  %vm255_vm3 = vcmask 261120   ;;  %p449_p5 = pnand %p448_p3, %p444_p0 }
  0x1e   : > { %v248_v11 = vsel %vm247_vm9, 1, %v505_v0 }
  0x23   : > { %196 = vperm.xlu1 %413, %v194_v5   ;;  %178 = vperm.xlu0 %412, %v176_v6  }
  0x24   : > { %214 = vperm.xlu2 %414, %v212_v7  }
  0x2b   : > { %232 = vperm.xlu1 %413, %v230_v8   ;;  %223 = vperm.xlu0 %412, %v221_v9  }
  0x2c   : > { %241 = vperm.xlu2 %414, %v239_v10  }
  0x33   : > { %250 = vperm.xlu0 %412, %v248_v11  }
  0x76   : > { %v206_v14 = vpop.permute.xlu2 %205 }
  0x77   : > { %vm207_vm14 = vcmp.eq.s32.totalorder %v206_v14, 1 }
  0x7e   : > { %v215_v23 = vpop.permute.xlu2 %214 }
  0x7f   : > { %vm216_vm15 = vcmp.eq.s32.totalorder %v215_v23, 1 }
  0x86   : > { %v242_v35 = vpop.permute.xlu2 %241 }
  0x87   : > { %vm243_vm2 = vcmp.eq.s32.totalorder %v242_v35, 1 }
  0x8d   : > { %v188_v12 = vpop.permute.xlu1 %187  ;;  %v170_v13 = vpop.permute.xlu0 %169 }
  0x8e   : > { %vm171_vm10 = vcmp.eq.s32.totalorder %v170_v13, 1  ;;  %vm189_vm12 = vcmp.eq.s32.totalorder %v188_v12, 1 }
  0x8f   : > { %v173_v21 = vsel %vm171_vm10, %v415_v15, 0.0 }
  0x95   : > { %v197_v18 = vpop.permute.xlu1 %196  ;;  %v179_v20 = vpop.permute.xlu0 %178 }
  0x96   : > { %vm180_vm11 = vcmp.eq.s32.totalorder %v179_v20, 1  ;;  %vm198_vm13 = vcmp.eq.s32.totalorder %v197_v18, 1 }
  0x97   : > { %v182_v22 = vsel %vm180_vm11, %v416_v16, %v173_v21 }
  0x98   : > { %v191_v24 = vsel %vm189_vm12, %v417_v17, %v182_v22 }
  0x99   : > { %v200_v26 = vsel %vm198_vm13, %v418_v19, %v191_v24 }
  0x9a   : > { %v209_v28 = vsel %vm207_vm14, %v419_v25, %v200_v26 }
  0x9b   : > { %v218_v32 = vsel %vm216_vm15, %v420_v27, %v209_v28 }
  0x9d   : > { %v233_v30 = vpop.permute.xlu1 %232  ;;  %v224_v31 = vpop.permute.xlu0 %223 }
  0x9e   : > { %vm225_vm0 = vcmp.eq.s32.totalorder %v224_v31, 1  ;;  %vm234_vm1 = vcmp.eq.s32.totalorder %v233_v30, 1 }
  0x9f   : > { %v227_v34 = vsel %vm225_vm0, %v421_v29, %v218_v32 }
  0xa0   : > { %v236_v37 = vsel %vm234_vm1, %v422_v33, %v227_v34 }
  0xa1   : > { %v245_v40 = vsel %vm243_vm2, %v423_v36, %v236_v37 }
  0xa5   : > { %v251_v39 = vpop.permute.xlu0 %250 }
  0xa6   : > { %vm252_vm4 = vcmp.eq.s32.totalorder %v251_v39, 1 }
  0xa7   : > { %v254_v41 = vsel %vm252_vm4, %v424_v38, %v245_v40 }
  0xa8   : > { %256 = vst.msk [vmem:[%s156_s7] sm:$0xff] %vm255_vm3, %v254_v41 }
  0xa9   : > { %452 = shalt.err (!%p449_p5)
}
  0xaa   : > { %356 = dma.vmem_to_hbm [thread:$0]  (%p561_p4), %s272_s8, 128, %s274_s15, %s258_s18  }
  0xab PF: > { %p362_p6 = scmp.ge.s32.totalorder %s503_s14, 2  ;;  %s285_s16 = sand.u32 1, %s483_s9  }
  0xac   : > { %s286_s29 = scalar_lea.sflag [#allocation3], %s285_s16 }
  0xad   : > { %p359_p7 = pnand %p362_p6, %p568_p8 }
  0xaf   : > { %p360_p9 = pneg %p359_p7 }
  0xb1   : > { %478 = dma.done.wait (%p360_p9), %s286_s29, 128  }
  0xb2   : > { %480 = vsyncadd (%p360_p9), %s286_s29, 4294967168  ;;  %s15_s14 = sadd.s32 1, %s503_s14   ;;  %s657_s9 = smov %s487_s10 }
  0xb3   : > { %p12_p10 = scmp.ge.s32.totalorder %s15_s14, 4   ;;  %s658_s10 = smov %s491_s11 }
  0xb4   : > { %s659_s11 = smov %s574_s22  ;;  %s660_s12 = smov %s499_s13 }
  0xb5   : > { %s661_s13 = smov %s663_s17  ;;  %14 = sbr.rel (!%p12_p10) target bundleno = 4 (0x4), region = 63 }
  0xba   :  { %292 = vsyncpa [#allocation3], 1 }
  0xbb   :  { %294 = vsyncpa [#allocation3 + $0x1], 1 }

</bundles_post_ra>
